<compile_context>
chip_gen: v5e
topology: v5e:2x2
jax: 0.10.0
libtpu: 0.0.40
codegen_flags: <defaults>
</compile_context>

<pallas_src>
import jax
import jax.numpy as jnp
from jax.experimental import pallas as pl
from jax.experimental.pallas import tpu as pltpu


def _round_up(x, m):
    return ((x + m - 1) // m) * m


def _fused_kernel(img_ref, txt_ref,
                  wi_ref, bi_ref,
                  wt_ref, bt_ref,
                  ws_ref, bs_ref,
                  wc_ref, bc_ref,
                  f1_ref, f2_ref, p1_ref, p2_ref):
    """One batch tile of both views: encoder -> relu -> shared -> classifier."""
    cdt = ws_ref.dtype           # MXU operand dtype (bf16 by default)
    tb = f1_ref.shape[0]         # batch tile size (static)

    # Per-view encoder (different K dims Di / Dt), f32 accumulate on the MXU.
    h_img = jnp.dot(img_ref[...], wi_ref[...], preferred_element_type=jnp.float32)
    h_img = jnp.maximum(h_img + bi_ref[...], 0.0)
    h_txt = jnp.dot(txt_ref[...], wt_ref[...], preferred_element_type=jnp.float32)
    h_txt = jnp.maximum(h_txt + bt_ref[...], 0.0)

    # Stack both views so the shared / classifier weights are pushed through
    # the MXU once per grid step (2*tile_b LHS rows fill the 256-tall MXU).
    h = jnp.concatenate([h_img, h_txt], axis=0).astype(cdt)
    feat = jnp.dot(h, ws_ref[...], preferred_element_type=jnp.float32) + bs_ref[...]
    pred = jnp.dot(feat.astype(cdt), wc_ref[...],
                   preferred_element_type=jnp.float32) + bc_ref[...]

    f1_ref[...] = feat[:tb].astype(f1_ref.dtype)
    f2_ref[...] = feat[tb:].astype(f2_ref.dtype)
    p1_ref[...] = pred[:tb].astype(p1_ref.dtype)
    p2_ref[...] = pred[tb:].astype(p2_ref.dtype)


def _resident_spec(shape, index_map):
    """BlockSpec for a grid-invariant operand; single-buffered when supported."""
    if hasattr(pl, "Buffered"):
        return pl.BlockSpec(shape, index_map, pipeline_mode=pl.Buffered(1))
    return pl.BlockSpec(shape, index_map)


def _physical_vmem_bytes():
    try:
        info = pltpu.get_tpu_info()
        return int(getattr(info, "vmem_capacity_bytes", 64 * 1024 * 1024))
    except Exception:
        return 64 * 1024 * 1024   # conservative: v7x per-TensorCore VMEM


def idcm_nn_forward(img, text, params, *, weight_dtype=jnp.bfloat16, tile_b=None):
    """Replicates IDCM_NN.forward(img, text) with one fused Pallas call."""
    if params["img_w"].shape[1] != params["text_w"].shape[1]:
        raise ValueError(
            "shared linearLayer requires img_output_dim == text_output_dim")
    if img.shape[0] != text.shape[0]:
        raise ValueError("img and text must share the batch dimension")

    B = img.shape[0]
    Di = img.shape[1]
    Dt = text.shape[1]
    H = params["img_w"].shape[1]
    M = params["shared_w"].shape[1]
    C = params["cls_w"].shape[1]

    # Lane-dense widths (multiples of 128); zero padding is mathematically
    # transparent (relu(0)=0 rows feed zero-padded ws rows) and sliced off below.
    Hp = _round_up(H, 128)
    Mp = _round_up(M, 128)
    Cp = _round_up(C, 128)

    def pad_cols(a, n):
        return a if a.shape[1] == n else jnp.pad(a, ((0, 0), (0, n - a.shape[1])))

    def pad_rows(a, n):
        return a if a.shape[0] == n else jnp.pad(a, ((0, n - a.shape[0]), (0, 0)))

    # Weights on the MXU path in weight_dtype (bf16 halves HBM/VMEM traffic);
    # biases stay f32 (tiny, added after the f32 accumulate).
    # TODO(synk): optional fp8 storage for wi/wt on v7x (native fp8 MXU) gated
    # behind an accuracy flag.
    wi = pad_cols(params["img_w"], Hp).astype(weight_dtype)
    wt = pad_cols(params["text_w"], Hp).astype(weight_dtype)
    ws = pad_cols(pad_rows(params["shared_w"], Hp), Mp).astype(weight_dtype)
    wc = pad_cols(pad_rows(params["cls_w"], Mp), Cp).astype(weight_dtype)
    bi = pad_cols(params["img_b"].astype(jnp.float32), Hp)
    bt = pad_cols(params["text_b"].astype(jnp.float32), Hp)
    bs = pad_cols(params["shared_b"].astype(jnp.float32), Mp)
    bc = pad_cols(params["cls_b"].astype(jnp.float32), Cp)

    # Batch tiling: multiples of 16 (bf16 sublane packing). Default 256 fills
    # the 256-tall MXU on v6e/v7x; shrink so the grid has >=2 steps when the
    # batch allows it (both v7x TensorCores get work).
    if tile_b is None:
        tile_b = 256
        while tile_b > 16 and pl.cdiv(B, tile_b) < 2:
            tile_b //= 2
        tile_b = max(tile_b, 16)
    tile_b = _round_up(tile_b, 16)
    Bp = _round_up(B, tile_b)
    grid = (Bp // tile_b,)

    # Activations streamed in the MXU operand dtype (halves input DMA).
    img_p = img.astype(weight_dtype)
    txt_p = text.astype(weight_dtype)
    if Bp != B:
        img_p = jnp.pad(img_p, ((0, Bp - B), (0, 0)))
        txt_p = jnp.pad(txt_p, ((0, Bp - B), (0, 0)))

    def batch_map(i):
        return (i, 0)

    def const_map(i):
        return (0, 0)

    in_specs = [
        pl.BlockSpec((tile_b, Di), batch_map),
        pl.BlockSpec((tile_b, Dt), batch_map),
        _resident_spec(wi.shape, const_map),
        _resident_spec(bi.shape, const_map),
        _resident_spec(wt.shape, const_map),
        _resident_spec(bt.shape, const_map),
        _resident_spec(ws.shape, const_map),
        _resident_spec(bs.shape, const_map),
        _resident_spec(wc.shape, const_map),
        _resident_spec(bc.shape, const_map),
    ]
    out_specs = (
        pl.BlockSpec((tile_b, Mp), batch_map),
        pl.BlockSpec((tile_b, Mp), batch_map),
        pl.BlockSpec((tile_b, Cp), batch_map),
        pl.BlockSpec((tile_b, Cp), batch_map),
    )
    out_shape = (
        jax.ShapeDtypeStruct((Bp, Mp), jnp.float32),
        jax.ShapeDtypeStruct((Bp, Mp), jnp.float32),
        jax.ShapeDtypeStruct((Bp, Cp), jnp.float32),
        jax.ShapeDtypeStruct((Bp, Cp), jnp.float32),
    )

    # VMEM budget: single-buffered resident weights + double-buffered per-tile
    # I/O + temporaries, capped at ~85% of physical VMEM (generation-aware).
    w_item = jnp.dtype(weight_dtype).itemsize
    weight_bytes = (wi.size + wt.size + ws.size + wc.size) * w_item \
        + (bi.size + bt.size + bs.size + bc.size) * 4
    in_tile_bytes = tile_b * (Di + Dt) * w_item
    out_tile_bytes = tile_b * 2 * (Mp + Cp) * 4
    temp_bytes = 2 * tile_b * (Hp + Mp + Cp) * (4 + w_item)
    needed = weight_bytes + 2 * (in_tile_bytes + out_tile_bytes) + temp_bytes
    vmem_cap = int(_physical_vmem_bytes() * 0.85)
    vmem_limit = int(min(max(int(1.25 * needed), 32 * 1024 * 1024), vmem_cap))

    flops = 2 * Bp * (Di * Hp + Dt * Hp + 2 * (Hp * Mp + Mp * Cp))
    bytes_accessed = int(weight_bytes
                         + Bp * (Di + Dt) * w_item
                         + Bp * 2 * (Mp + Cp) * 4)

    f1, f2, p1, p2 = pl.pallas_call(
        _fused_kernel,
        out_shape=out_shape,
        grid=grid,
        in_specs=in_specs,
        out_specs=out_specs,
        compiler_params=pltpu.CompilerParams(
            dimension_semantics=("parallel",),
            vmem_limit_bytes=vmem_limit,
        ),
        cost_estimate=pl.CostEstimate(
            flops=flops, transcendentals=0, bytes_accessed=bytes_accessed),
    )(img_p, txt_p, wi, bi, wt, bt, ws, bs, wc, bc)

    if Bp == B and Mp == M and Cp == C:
        return (f1, f2, p1, p2)
    return (f1[:B, :M], f2[:B, :M], p1[:B, :C], p2[:B, :C])


def init_params(key, img_input_dim, img_output_dim,
                text_input_dim, text_output_dim,
                minus_one_dim, output_dim):
    """Deterministic synthetic init. Weights stored as (in, out); biases as (1, out)."""
    ks = jax.random.split(key, 8)

    def lin(kw, kb, fan_in, fan_out):
        bound = 1.0 / jnp.sqrt(fan_in)
        w = jax.random.uniform(kw, (fan_in, fan_out), jnp.float32, -bound, bound)
        b = jax.random.uniform(kb, (1, fan_out), jnp.float32, -bound, bound)
        return w, b

    img_w, img_b = lin(ks[0], ks[1], img_input_dim, img_output_dim)
    text_w, text_b = lin(ks[2], ks[3], text_input_dim, text_output_dim)
    shared_w, shared_b = lin(ks[4], ks[5], img_output_dim, minus_one_dim)
    cls_w, cls_b = lin(ks[6], ks[7], minus_one_dim, output_dim)
    return dict(img_w=img_w, img_b=img_b,
                text_w=text_w, text_b=text_b,
                shared_w=shared_w, shared_b=shared_b,
                cls_w=cls_w, cls_b=cls_b)


def _reference(img, text, p):
    """Pure-JAX f32 reference mirroring the PyTorch forward."""
    v1 = jnp.maximum(img @ p["img_w"] + p["img_b"], 0.0)
    v2 = jnp.maximum(text @ p["text_w"] + p["text_b"], 0.0)
    f1 = v1 @ p["shared_w"] + p["shared_b"]
    f2 = v2 @ p["shared_w"] + p["shared_b"]
    p1 = f1 @ p["cls_w"] + p["cls_b"]
    p2 = f2 @ p["cls_w"] + p["cls_b"]
    return f1, f2, p1, p2


if __name__ == "__main__":
    # Small shapes consistent with the module's forward:
    #  img:  (batch, img_input_dim); text: (batch, text_input_dim)
    #  img_output_dim must equal text_output_dim (shared linearLayer).
    batch = 8
    img_input_dim, img_output_dim = 32, 32
    text_input_dim, text_output_dim = 16, 32
    minus_one_dim, output_dim = 16, 8

    key = jax.random.PRNGKey(0)
    k_img, k_text, k_params = jax.random.split(key, 3)
    img = jax.random.normal(k_img, (batch, img_input_dim), jnp.float32)
    text = jax.random.normal(k_text, (batch, text_input_dim), jnp.float32)

    params = init_params(k_params, img_input_dim, img_output_dim,
                         text_input_dim, text_output_dim,
                         minus_one_dim, output_dim)

    # jit so the wrapper-side pad/cast/slice plumbing fuses with the kernel call.
    fwd = jax.jit(idcm_nn_forward)
    outs = fwd(img, text, params)
    outs = jax.block_until_ready(outs)

    refs = _reference(img, text, params)
    names = ("view1_feature", "view2_feature", "view1_predict", "view2_predict")
    for name, o, r in zip(names, outs, refs):
        assert o.shape == r.shape and o.dtype == r.dtype, name
        # bf16 weights AND activations on the MXU path vs f32 reference.
        assert jnp.allclose(o, r, atol=3e-2, rtol=3e-2), name

    print("KERNEL_OK")
</pallas_src>

<mosaic_0001>
module attributes {stable_mosaic.version = 11 : i64} {
  func.func @_fused_kernel(%arg0: i32, %arg1: memref<16x32xbf16, #tpu.memory_space<vmem>>, %arg2: memref<16x16xbf16, #tpu.memory_space<vmem>>, %arg3: memref<32x128xbf16, #tpu.memory_space<vmem>>, %arg4: memref<1x128xf32, #tpu.memory_space<vmem>>, %arg5: memref<16x128xbf16, #tpu.memory_space<vmem>>, %arg6: memref<1x128xf32, #tpu.memory_space<vmem>>, %arg7: memref<128x128xbf16, #tpu.memory_space<vmem>>, %arg8: memref<1x128xf32, #tpu.memory_space<vmem>>, %arg9: memref<128x128xbf16, #tpu.memory_space<vmem>>, %arg10: memref<1x128xf32, #tpu.memory_space<vmem>>, %arg11: memref<16x128xf32, #tpu.memory_space<vmem>>, %arg12: memref<16x128xf32, #tpu.memory_space<vmem>>, %arg13: memref<16x128xf32, #tpu.memory_space<vmem>>, %arg14: memref<16x128xf32, #tpu.memory_space<vmem>>) attributes {dimension_semantics = [#tpu.dimension_semantics<parallel>], iteration_bounds = array<i64: 1>, scalar_prefetch = 0 : i64, scratch_operands = 0 : i64, tpu.core_type = #tpu.core_type<tc>, window_params = [{transform_indices = @transform_0, window_bounds = array<i64: 16, 32>}, {transform_indices = @transform_1, window_bounds = array<i64: 16, 16>}, {pipeline_mode = #tpu.pipeline_mode<synchronous>, transform_indices = @transform_2, window_bounds = array<i64: 32, 128>}, {pipeline_mode = #tpu.pipeline_mode<synchronous>, transform_indices = @transform_3, window_bounds = array<i64: 1, 128>}, {pipeline_mode = #tpu.pipeline_mode<synchronous>, transform_indices = @transform_4, window_bounds = array<i64: 16, 128>}, {pipeline_mode = #tpu.pipeline_mode<synchronous>, transform_indices = @transform_5, window_bounds = array<i64: 1, 128>}, {pipeline_mode = #tpu.pipeline_mode<synchronous>, transform_indices = @transform_6, window_bounds = array<i64: 128, 128>}, {pipeline_mode = #tpu.pipeline_mode<synchronous>, transform_indices = @transform_7, window_bounds = array<i64: 1, 128>}, {pipeline_mode = #tpu.pipeline_mode<synchronous>, transform_indices = @transform_8, window_bounds = array<i64: 128, 128>}, {pipeline_mode = #tpu.pipeline_mode<synchronous>, transform_indices = @transform_9, window_bounds = array<i64: 1, 128>}, {transform_indices = @transform_10, window_bounds = array<i64: 16, 128>}, {transform_indices = @transform_11, window_bounds = array<i64: 16, 128>}, {transform_indices = @transform_12, window_bounds = array<i64: 16, 128>}, {transform_indices = @transform_13, window_bounds = array<i64: 16, 128>}]} {
    %c0 = arith.constant 0 : index
    %c0_0 = arith.constant 0 : index
    %0 = vector.load %arg1[%c0, %c0_0] : memref<16x32xbf16, #tpu.memory_space<vmem>>, vector<16x32xbf16>
    %c0_1 = arith.constant 0 : index
    %c0_2 = arith.constant 0 : index
    %1 = vector.load %arg3[%c0_1, %c0_2] : memref<32x128xbf16, #tpu.memory_space<vmem>>, vector<32x128xbf16>
    %cst = arith.constant dense<0.000000e+00> : vector<16x128xf32>
    %2 = tpu.matmul %0, %1, %cst {dimension_numbers = #tpu.dot_dimension_numbers<[1], [0], [0], [1], [0, 0, 1, 1], [], []>} : vector<16x32xbf16>, vector<32x128xbf16>, vector<16x128xf32> -> vector<16x128xf32>
    %c0_3 = arith.constant 0 : index
    %c0_4 = arith.constant 0 : index
    %3 = vector.load %arg4[%c0_3, %c0_4] : memref<1x128xf32, #tpu.memory_space<vmem>>, vector<1x128xf32>
    %4 = vector.broadcast %3 : vector<1x128xf32> to vector<16x128xf32>
    %5 = arith.addf %2, %4 : vector<16x128xf32>
    %cst_5 = arith.constant 0.000000e+00 : f32
    %6 = vector.broadcast %cst_5 : f32 to vector<16x128xf32>
    %7 = arith.maximumf %5, %6 : vector<16x128xf32>
    %c0_6 = arith.constant 0 : index
    %c0_7 = arith.constant 0 : index
    %8 = vector.load %arg2[%c0_6, %c0_7] : memref<16x16xbf16, #tpu.memory_space<vmem>>, vector<16x16xbf16>
    %c0_8 = arith.constant 0 : index
    %c0_9 = arith.constant 0 : index
    %9 = vector.load %arg5[%c0_8, %c0_9] : memref<16x128xbf16, #tpu.memory_space<vmem>>, vector<16x128xbf16>
    %cst_10 = arith.constant dense<0.000000e+00> : vector<16x128xf32>
    %10 = tpu.matmul %8, %9, %cst_10 {dimension_numbers = #tpu.dot_dimension_numbers<[1], [0], [0], [1], [0, 0, 1, 1], [], []>} : vector<16x16xbf16>, vector<16x128xbf16>, vector<16x128xf32> -> vector<16x128xf32>
    %c0_11 = arith.constant 0 : index
    %c0_12 = arith.constant 0 : index
    %11 = vector.load %arg6[%c0_11, %c0_12] : memref<1x128xf32, #tpu.memory_space<vmem>>, vector<1x128xf32>
    %12 = vector.broadcast %11 : vector<1x128xf32> to vector<16x128xf32>
    %13 = arith.addf %10, %12 : vector<16x128xf32>
    %cst_13 = arith.constant 0.000000e+00 : f32
    %14 = vector.broadcast %cst_13 : f32 to vector<16x128xf32>
    %15 = arith.maximumf %13, %14 : vector<16x128xf32>
    %16 = tpu.concatenate %7, %15 in 0 : vector<16x128xf32>, vector<16x128xf32> -> vector<32x128xf32>
    %17 = arith.truncf %16 : vector<32x128xf32> to vector<32x128xbf16>
    %c0_14 = arith.constant 0 : index
    %c0_15 = arith.constant 0 : index
    %18 = vector.load %arg7[%c0_14, %c0_15] : memref<128x128xbf16, #tpu.memory_space<vmem>>, vector<128x128xbf16>
    %cst_16 = arith.constant dense<0.000000e+00> : vector<32x128xf32>
    %19 = tpu.matmul %17, %18, %cst_16 {dimension_numbers = #tpu.dot_dimension_numbers<[1], [0], [0], [1], [0, 0, 1, 1], [], []>} : vector<32x128xbf16>, vector<128x128xbf16>, vector<32x128xf32> -> vector<32x128xf32>
    %c0_17 = arith.constant 0 : index
    %c0_18 = arith.constant 0 : index
    %20 = vector.load %arg8[%c0_17, %c0_18] : memref<1x128xf32, #tpu.memory_space<vmem>>, vector<1x128xf32>
    %21 = vector.broadcast %20 : vector<1x128xf32> to vector<32x128xf32>
    %22 = arith.addf %19, %21 : vector<32x128xf32>
    %23 = arith.truncf %22 : vector<32x128xf32> to vector<32x128xbf16>
    %c0_19 = arith.constant 0 : index
    %c0_20 = arith.constant 0 : index
    %24 = vector.load %arg9[%c0_19, %c0_20] : memref<128x128xbf16, #tpu.memory_space<vmem>>, vector<128x128xbf16>
    %cst_21 = arith.constant dense<0.000000e+00> : vector<32x128xf32>
    %25 = tpu.matmul %23, %24, %cst_21 {dimension_numbers = #tpu.dot_dimension_numbers<[1], [0], [0], [1], [0, 0, 1, 1], [], []>} : vector<32x128xbf16>, vector<128x128xbf16>, vector<32x128xf32> -> vector<32x128xf32>
    %c0_22 = arith.constant 0 : index
    %c0_23 = arith.constant 0 : index
    %26 = vector.load %arg10[%c0_22, %c0_23] : memref<1x128xf32, #tpu.memory_space<vmem>>, vector<1x128xf32>
    %27 = vector.broadcast %26 : vector<1x128xf32> to vector<32x128xf32>
    %28 = arith.addf %25, %27 : vector<32x128xf32>
    %29 = vector.extract_strided_slice %22 {offsets = [0, 0], sizes = [16, 128], strides = [1, 1]} : vector<32x128xf32> to vector<16x128xf32>
    %c0_24 = arith.constant 0 : index
    %c0_25 = arith.constant 0 : index
    %30 = vector.load %arg11[%c0_24, %c0_25] : memref<16x128xf32, #tpu.memory_space<vmem>>, vector<16x128xf32>
    tpu.vector_store %arg11[%c0_24, %c0_25], %29 {strides = array<i32>} : memref<16x128xf32, #tpu.memory_space<vmem>>, vector<16x128xf32>,
    %31 = vector.extract_strided_slice %22 {offsets = [16, 0], sizes = [16, 128], strides = [1, 1]} : vector<32x128xf32> to vector<16x128xf32>
    %c0_26 = arith.constant 0 : index
    %c0_27 = arith.constant 0 : index
    %32 = vector.load %arg12[%c0_26, %c0_27] : memref<16x128xf32, #tpu.memory_space<vmem>>, vector<16x128xf32>
    tpu.vector_store %arg12[%c0_26, %c0_27], %31 {strides = array<i32>} : memref<16x128xf32, #tpu.memory_space<vmem>>, vector<16x128xf32>,
    %33 = vector.extract_strided_slice %28 {offsets = [0, 0], sizes = [16, 128], strides = [1, 1]} : vector<32x128xf32> to vector<16x128xf32>
    %c0_28 = arith.constant 0 : index
    %c0_29 = arith.constant 0 : index
    %34 = vector.load %arg13[%c0_28, %c0_29] : memref<16x128xf32, #tpu.memory_space<vmem>>, vector<16x128xf32>
    tpu.vector_store %arg13[%c0_28, %c0_29], %33 {strides = array<i32>} : memref<16x128xf32, #tpu.memory_space<vmem>>, vector<16x128xf32>,
    %35 = vector.extract_strided_slice %28 {offsets = [16, 0], sizes = [16, 128], strides = [1, 1]} : vector<32x128xf32> to vector<16x128xf32>
    %c0_30 = arith.constant 0 : index
    %c0_31 = arith.constant 0 : index
    %36 = vector.load %arg14[%c0_30, %c0_31] : memref<16x128xf32, #tpu.memory_space<vmem>>, vector<16x128xf32>
    tpu.vector_store %arg14[%c0_30, %c0_31], %35 {strides = array<i32>} : memref<16x128xf32, #tpu.memory_space<vmem>>, vector<16x128xf32>,
    return
  }
  func.func @transform_0(%arg0: i32) -> (i32, i32) {
    %c0_i32 = arith.constant 0 : i32
    %c0_i32_0 = arith.constant 0 : i32
    return %arg0, %c0_i32 : i32, i32
  }
  func.func @transform_1(%arg0: i32) -> (i32, i32) {
    %c0_i32 = arith.constant 0 : i32
    %c0_i32_0 = arith.constant 0 : i32
    return %arg0, %c0_i32 : i32, i32
  }
  func.func @transform_2(%arg0: i32) -> (i32, i32) {
    %c0_i32 = arith.constant 0 : i32
    %c0_i32_0 = arith.constant 0 : i32
    %c0_i32_1 = arith.constant 0 : i32
    return %c0_i32, %c0_i32_0 : i32, i32
  }
  func.func @transform_3(%arg0: i32) -> (i32, i32) {
    %c0_i32 = arith.constant 0 : i32
    %c0_i32_0 = arith.constant 0 : i32
    %c0_i32_1 = arith.constant 0 : i32
    return %c0_i32, %c0_i32_0 : i32, i32
  }
  func.func @transform_4(%arg0: i32) -> (i32, i32) {
    %c0_i32 = arith.constant 0 : i32
    %c0_i32_0 = arith.constant 0 : i32
    %c0_i32_1 = arith.constant 0 : i32
    return %c0_i32, %c0_i32_0 : i32, i32
  }
  func.func @transform_5(%arg0: i32) -> (i32, i32) {
    %c0_i32 = arith.constant 0 : i32
    %c0_i32_0 = arith.constant 0 : i32
    %c0_i32_1 = arith.constant 0 : i32
    return %c0_i32, %c0_i32_0 : i32, i32
  }
  func.func @transform_6(%arg0: i32) -> (i32, i32) {
    %c0_i32 = arith.constant 0 : i32
    %c0_i32_0 = arith.constant 0 : i32
    %c0_i32_1 = arith.constant 0 : i32
    return %c0_i32, %c0_i32_0 : i32, i32
  }
  func.func @transform_7(%arg0: i32) -> (i32, i32) {
    %c0_i32 = arith.constant 0 : i32
    %c0_i32_0 = arith.constant 0 : i32
    %c0_i32_1 = arith.constant 0 : i32
    return %c0_i32, %c0_i32_0 : i32, i32
  }
  func.func @transform_8(%arg0: i32) -> (i32, i32) {
    %c0_i32 = arith.constant 0 : i32
    %c0_i32_0 = arith.constant 0 : i32
    %c0_i32_1 = arith.constant 0 : i32
    return %c0_i32, %c0_i32_0 : i32, i32
  }
  func.func @transform_9(%arg0: i32) -> (i32, i32) {
    %c0_i32 = arith.constant 0 : i32
    %c0_i32_0 = arith.constant 0 : i32
    %c0_i32_1 = arith.constant 0 : i32
    return %c0_i32, %c0_i32_0 : i32, i32
  }
  func.func @transform_10(%arg0: i32) -> (i32, i32) {
    %c0_i32 = arith.constant 0 : i32
    %c0_i32_0 = arith.constant 0 : i32
    return %arg0, %c0_i32 : i32, i32
  }
  func.func @transform_11(%arg0: i32) -> (i32, i32) {
    %c0_i32 = arith.constant 0 : i32
    %c0_i32_0 = arith.constant 0 : i32
    return %arg0, %c0_i32 : i32, i32
  }
  func.func @transform_12(%arg0: i32) -> (i32, i32) {
    %c0_i32 = arith.constant 0 : i32
    %c0_i32_0 = arith.constant 0 : i32
    return %arg0, %c0_i32 : i32, i32
  }
  func.func @transform_13(%arg0: i32) -> (i32, i32) {
    %c0_i32 = arith.constant 0 : i32
    %c0_i32_0 = arith.constant 0 : i32
    return %arg0, %c0_i32 : i32, i32
  }
}

</mosaic_0001>

<bundles_post_ra>
// kernel: idcm_nn_forward.1
= control target key start
LH: loop header
LB: loop body
LE: loop exit
PB: predicated region body
PF: predicated region fallthrough
CT: control target
= control target key end

     0   :  { %vm106_vm0 = vcmask 130048   ;;  %vm67_vm1 = vcmask 261120   ;;  %s624_s2 = inlined_call_operand.vmem [shape: bf16[32,128], index: 2, kind: input, shape index: {}]   ;;  %s625_s4 = inlined_call_operand.vmem [shape: bf16[16,128], index: 4, kind: input, shape index: {}]   ;;  %s626_s1 = inlined_call_operand.vmem [shape: bf16[16,16], index: 1, kind: input, shape index: {}]   ;;  %s627_s6 = inlined_call_operand.vmem [shape: bf16[128,128], index: 6, kind: input, shape index: {}]   ;;  %s628_s0 = inlined_call_operand.vmem [shape: bf16[16,32], index: 0, kind: input, shape index: {}]   ;;  %s629_s5 = inlined_call_operand.vmem [shape: f32[1,128], index: 5, kind: input, shape index: {}]   ;;  %s630_s3 = inlined_call_operand.vmem [shape: f32[1,128], index: 3, kind: input, shape index: {}]   ;;  %s631_s7 = inlined_call_operand.vmem [shape: f32[1,128], index: 7, kind: input, shape index: {}]   ;;  %s632_s8 = inlined_call_operand.vmem [shape: bf16[128,128], index: 8, kind: input, shape index: {}]   ;;  %s633_s9 = inlined_call_operand.vmem [shape: f32[1,128], index: 9, kind: input, shape index: {}]   ;;  %s634_s10 = inlined_call_operand.vmem [shape: f32[16,128], index: 10, kind: output, shape index: {0}]   ;;  %s635_s11 = inlined_call_operand.vmem [shape: f32[16,128], index: 11, kind: output, shape index: {1}]   ;;  %s636_s12 = inlined_call_operand.vmem [shape: f32[16,128], index: 12, kind: output, shape index: {2}]   ;;  %s637_s13 = inlined_call_operand.vmem [shape: f32[16,128], index: 13, kind: output, shape index: {3}]  }
   0x1   :  { %v416_v0 = vld [vmem:[%s624_s2 + $0x8] sm:$0xff]  ;;  %v418_v1 = vld [vmem:[%s625_s4] sm:$0xff]  ;;  %v426_v3 = vld [vmem:[%s627_s6 + $0x38] sm:$0xff] }
   0x2   :  { %v417_v2 = vld [vmem:[%s626_s1] sm:$0xff]  ;;  %77 = vmatpush.bf16.msra.mxu0 %v416_v0  ;;  %117 = vmatpush.bf16.msra.mxu1 %v418_v1  ;;  %v425_v5 = vld [vmem:[%s627_s6 + $0x30] sm:$0xff]  ;;  %v424_v7 = vld [vmem:[%s627_s6 + $0x28] sm:$0xff] }
   0x3   :  { %v415_v4 = vld [vmem:[%s624_s2] sm:$0xff]  ;;  %435 = vmatpush.bf16.msra.mxu2 %v426_v3  ;;  %v422_v9 = vld [vmem:[%s627_s6 + $0x18] sm:$0xff]  ;;  %v421_v10 = vld [vmem:[%s627_s6 + $0x10] sm:$0xff] }
   0x4   :  { %v414_v6 = vld [vmem:[%s628_s0] sm:$0xff]  ;;  %v420_v11 = vld [vmem:[%s627_s6 + $0x8] sm:$0xff]  ;;  %v434_v13 = vld [vmem:[%s632_s8 + $0x38] sm:$0xff] }
   0x5   :  { %349 = vmatmul.msk.bf16.vlgmr.msra.gmra.mxu1 %vm106_vm0, %v417_v2  ;;  %v423_v8 = vld [vmem:[%s627_s6 + $0x20] sm:$0xff]  ;;  %443 = vmatpush.bf16.msra.mxu3 %v434_v13  ;;  %v433_v14 = vld [vmem:[%s632_s8 + $0x30] sm:$0xff]  ;;  %v432_v15 = vld [vmem:[%s632_s8 + $0x28] sm:$0xff] }
   0x6   :  { %196 = vmatpush.bf16.msrb.mxu1 %v426_v3  ;;  %78 = vmatpush.bf16.msra.mxu0 %v415_v4  ;;  %v419_v12 = vld [vmem:[%s627_s6] sm:$0xff]  ;;  %v430_v18 = vld [vmem:[%s632_s8 + $0x18] sm:$0xff]  ;;  %v429_v34 = vld [vmem:[%s632_s8 + $0x10] sm:$0xff] }
   0x7   :  { %436 = vmatpush.bf16.msra.mxu2 %v425_v5  ;;  %v431_v16 = vld [vmem:[%s632_s8 + $0x20] sm:$0xff]  ;;  %v428_v35 = vld [vmem:[%s632_s8 + $0x8] sm:$0xff] }
   0x8   :  { %v451_v19 = vld [vmem:[%s629_s5] ss:$0 sm:$0xff] }
   0x9   :  { %340 = vmatmul.msk.bf16.vlgmr.msra.gmra.mxu0 %vm67_vm1, %v414_v6  ;;  %444 = vmatpush.bf16.msra.mxu3 %v433_v14  ;;  %v452_v21 = vld [vmem:[%s630_s3] ss:$0 sm:$0xff] }
   0xa   :  { %197 = vmatpush.bf16.msrb.mxu1 %v425_v5  ;;  %285 = vmatpush.bf16.msrb.mxu0 %v434_v13  ;;  %v427_v36 = vld [vmem:[%s632_s8] sm:$0xff] }
   0xb   :  { %437 = vmatpush.bf16.msra.mxu2 %v424_v7  ;;  %v453_v37 = vld [vmem:[%s631_s7] ss:$0 sm:$0xff] }
   0xc   :  { %v454_v48 = vld [vmem:[%s633_s9] ss:$0 sm:$0xff] }
   0xd   :  { %445 = vmatpush.bf16.msra.mxu3 %v432_v15 }
   0xe   :  { %198 = vmatpush.bf16.msrb.mxu1 %v424_v7  ;;  %286 = vmatpush.bf16.msrb.mxu0 %v433_v14 }
   0xf   :  { %438 = vmatpush.bf16.msra.mxu2 %v423_v8 }
  0x11   :  { %446 = vmatpush.bf16.msra.mxu3 %v431_v16 }
  0x12   :  { %199 = vmatpush.bf16.msrb.mxu1 %v423_v8  ;;  %287 = vmatpush.bf16.msrb.mxu0 %v432_v15 }
  0x13   :  { %439 = vmatpush.bf16.msra.mxu2 %v422_v9 }
  0x15   :  { %447 = vmatpush.bf16.msra.mxu3 %v430_v18 }
  0x16   :  { %200 = vmatpush.bf16.msrb.mxu1 %v422_v9  ;;  %288 = vmatpush.bf16.msrb.mxu0 %v431_v16 }
  0x17   :  { %440 = vmatpush.bf16.msra.mxu2 %v421_v10 }
  0x19   :  { %448 = vmatpush.bf16.msra.mxu3 %v429_v34 }
  0x1a   :  { %201 = vmatpush.bf16.msrb.mxu1 %v421_v10  ;;  %289 = vmatpush.bf16.msrb.mxu0 %v430_v18 }
  0x1b   :  { %441 = vmatpush.bf16.msra.mxu2 %v420_v11 }
  0x1d   :  { %449 = vmatpush.bf16.msra.mxu3 %v428_v35 }
  0x1e   :  { %202 = vmatpush.bf16.msrb.mxu1 %v420_v11  ;;  %290 = vmatpush.bf16.msrb.mxu0 %v429_v34 }
  0x1f   :  { %442 = vmatpush.bf16.msra.mxu2 %v419_v12 }
  0x21   :  { %450 = vmatpush.bf16.msra.mxu3 %v427_v36 }
  0x22   :  { %203 = vmatpush.bf16.msrb.mxu1 %v419_v12  ;;  %291 = vmatpush.bf16.msrb.mxu0 %v428_v35 }
  0x26   :  { %292 = vmatpush.bf16.msrb.mxu0 %v427_v36 }
  0x82   :  { %v119_v17 = vpop.f32.mrf.mxu1 }
  0x83   :  { %v120_v22 = vadd.f32 %v451_v19, %v119_v17 }
  0x85   :  { %v124_v26 = vmax.f32 %v120_v22, 0.0 }
  0x86   :  { %v80_v20 = vpop.f32.mrf.mxu0 }
  0x87   :  { %v81_v24 = vadd.f32 %v452_v21, %v80_v20 }
  0x89   :  { %v85_v29 = vmax.f32 %v81_v24, 0.0 }
  0x8a   :  { %v121_v23 = vpop.f32.mrf.mxu1 }
  0x8b   :  { %v122_v25 = vadd.f32 %v451_v19, %v121_v23 }
  0x8d   :  { %v125_v27 = vmax.f32 %v122_v25, 0.0 }
  0x8e   :  { %v82_v28 = vpop.f32.mrf.mxu0 }
  0x8f   :  { %v83_v30 = vadd.f32 %v452_v21, %v82_v28  ;;  %v127_v31 = vpack.c.bf16 %v125_v27, %v124_v26 }
  0x91   :  { %v86_v32 = vmax.f32 %v83_v30, 0.0  ;;  %209 = vmatmul.bf16.vlgmr.msra.gmra.mxu2 %v127_v31 }
  0x93   :  { %v126_v33 = vpack.c.bf16 %v86_v32, %v85_v29 }
  0x95   :  { %204 = vmatmul.bf16.vlgmr.msrb.gmra.mxu1 %v126_v33 }
 0x112   :  { %v205_v38 = vpop.f32.mrf.mxu1 }
 0x113   :  { %v206_v39 = vadd.f32 %v453_v37, %v205_v38 }
 0x114   :  { %v210_v40 = vpop.f32.mrf.mxu2 }
 0x115   :  { %304 = vst [vmem:[%s634_s10] sm:$0xff] %v206_v39  ;;  %v211_v41 = vadd.f32 %v453_v37, %v210_v40 }
 0x117   :  { %306 = vst [vmem:[%s635_s11] sm:$0xff] %v211_v41 }
 0x11a   :  { %v207_v42 = vpop.f32.mrf.mxu1 }
 0x11b   :  { %v208_v43 = vadd.f32 %v453_v37, %v207_v42 }
 0x11c   :  { %v212_v44 = vpop.f32.mrf.mxu2 }
 0x11d   :  { %v215_v45 = vpack.c.bf16 %v208_v43, %v206_v39  ;;  %305 = vst [vmem:[%s634_s10 + $0x8] sm:$0xff] %v208_v43  ;;  %v213_v46 = vadd.f32 %v453_v37, %v212_v44 }
 0x11f   :  { %307 = vst [vmem:[%s635_s11 + $0x8] sm:$0xff] %v213_v46  ;;  %293 = vmatmul.bf16.vlgmr.msrb.gmra.mxu0 %v215_v45  ;;  %v216_v47 = vpack.c.bf16 %v213_v46, %v211_v41 }
 0x121   :  { %298 = vmatmul.bf16.vlgmr.msra.gmra.mxu3 %v216_v47 }
 0x19c   :  { %v294_v49 = vpop.f32.mrf.mxu0 }
 0x19d   :  { %v295_v50 = vadd.f32 %v454_v48, %v294_v49 }
 0x19f   :  { %308 = vst [vmem:[%s636_s12] sm:$0xff] %v295_v50 }
 0x1a4   :  { %v296_v51 = vpop.f32.mrf.mxu0  ;;  %v299_v52 = vpop.f32.mrf.mxu3 }
 0x1a5   :  { %v297_v53 = vadd.f32 %v454_v48, %v296_v51  ;;  %v300_v54 = vadd.f32 %v454_v48, %v299_v52 }
 0x1a7   :  { %309 = vst [vmem:[%s636_s12 + $0x8] sm:$0xff] %v297_v53 }
 0x1a8   :  { %310 = vst [vmem:[%s637_s13] sm:$0xff] %v300_v54 }
 0x1ac   :  { %v301_v55 = vpop.f32.mrf.mxu3 }
 0x1ad   :  { %v302_v56 = vadd.f32 %v454_v48, %v301_v55 }
 0x1af   :  { %311 = vst [vmem:[%s637_s13 + $0x8] sm:$0xff] %v302_v56 }

</bundles_post_ra>
